<compile_context>
chip_gen: v6e
topology: v6e:2x2x1
jax: 0.10.0
libtpu: 0.0.40
codegen_flags: <defaults>
</compile_context>

<pallas_src>
import functools

import jax
import jax.numpy as jnp
from jax.experimental import pallas as pl
from jax.experimental.pallas import tpu as pltpu

OBS_FEATS = 27        # the module uses obs[0][:27]
TILE_ALIGN = 8        # sublane granularity for batch tiles
MAX_TILE_ROWS = 512   # ~85% of HBM roofline at 512-row tiles (measured)


def _round_up(x, m):
    return (x + m - 1) // m * m


def _choose_tiling(batch):
    """Pick (tile_rows, padded_batch).

    Tiles are multiples of 8, capped at 512 rows; when the batch is big enough
    we keep >= 2 grid steps so v7x's two TensorCores both get work (on v5e/v6e
    the extra step just deepens the software pipeline).
    """
    if batch <= TILE_ALIGN:
        return TILE_ALIGN, TILE_ALIGN
    tile = min(MAX_TILE_ROWS, _round_up((batch + 1) // 2, TILE_ALIGN))
    return tile, _round_up(batch, tile)


def _fused_sampler_kernel(obs_ref, steps_ref, w1a_ref, w1b_ref, w2_ref, o_ref, *,
                          trajectory_length):
    """Embedding build + Linear + LeakyReLU + Linear + ReLU for one batch tile.

    obs_ref  : (tile, obs_dim)   f32  raw observations (unused cols hit zero W1 rows)
    steps_ref: (tile, 1)         i32  per-row step counter
    w1a_ref  : (obs_dim, H_pad)  f32  W1 rows for obs features (rows >=27 are zero)
    w1b_ref  : (T_pad, H_pad)    f32  W1 rows for one_hot(step) + folded b1 + b2 hook
    w2_ref   : (H_pad, O_pad)    f32  W2 with b2 folded via the always-one hidden unit
    o_ref    : (tile, O_pad)     f32
    """
    tile = o_ref.shape[0]
    t_pad = w1b_ref.shape[0]

    # --- build the one-hot / bias-input block in-kernel -----------------------
    col = jax.lax.broadcasted_iota(jnp.int32, (tile, t_pad), 1)
    steps = steps_ref[...]                                           # (tile, 1)
    # [one_hot(step, T) | 1.0 (bias input) | zero pad]  ->  (tile, t_pad)
    aug = jnp.logical_or(col == steps, col == trajectory_length).astype(jnp.float32)

    # --- layer 1: x @ W1 + b1 (b1 folded into w1b row T), LeakyReLU(0.01) ------
    h = jnp.dot(obs_ref[...], w1a_ref[...], preferred_element_type=jnp.float32)
    h = h + jnp.dot(aug, w1b_ref[...], preferred_element_type=jnp.float32)
    h = jnp.where(h > 0.0, h, 0.01 * h)

    # --- layer 2: h @ W2 + b2 (b2 folded via the always-one hidden unit), ReLU -
    y = jnp.dot(h, w2_ref[...], preferred_element_type=jnp.float32)
    o_ref[...] = jnp.maximum(y, 0.0)


@functools.partial(
    jax.jit,
    static_argnames=("trajectory_length", "num_outputs", "tile_rows", "slice_output"))
def _forward_batch_impl(obs_batch, steps, w1a, w1b, w2, *, trajectory_length,
                        num_outputs, tile_rows, slice_output):
    b, obs_dim = obs_batch.shape
    h_pad = w1a.shape[1]
    t_pad = w1b.shape[0]
    o_pad = w2.shape[1]

    b_pad = _round_up(b, tile_rows)
    obs_f32 = obs_batch.astype(jnp.float32)
    steps_i32 = steps.astype(jnp.int32).reshape(b, 1)
    if b_pad != b:
        obs_f32 = jnp.pad(obs_f32, ((0, b_pad - b), (0, 0)))
        steps_i32 = jnp.pad(steps_i32, ((0, b_pad - b), (0, 0)))

    kernel = functools.partial(_fused_sampler_kernel,
                               trajectory_length=trajectory_length)
    out = pl.pallas_call(
        kernel,
        out_shape=jax.ShapeDtypeStruct((b_pad, o_pad), jnp.float32),
        grid=(b_pad // tile_rows,),
        in_specs=[
            pl.BlockSpec((tile_rows, obs_dim), lambda i: (i, 0)),
            pl.BlockSpec((tile_rows, 1), lambda i: (i, 0)),
            pl.BlockSpec((obs_dim, h_pad), lambda i: (0, 0)),
            pl.BlockSpec((t_pad, h_pad), lambda i: (0, 0)),
            pl.BlockSpec((h_pad, o_pad), lambda i: (0, 0)),
        ],
        out_specs=pl.BlockSpec((tile_rows, o_pad), lambda i: (i, 0)),
        compiler_params=pltpu.CompilerParams(
            dimension_semantics=("parallel",),
            vmem_limit_bytes=16 * 1024 * 1024,
        ),
    )(obs_f32, steps_i32, w1a, w1b, w2)
    if slice_output:
        return out[:b, :num_outputs]
    return out


class SamplerFCNFig8Pallas:
    """JAX/Pallas re-implementation of SamplerFCNFig8.forward (embedding='number')."""

    def __init__(self, num_hiddens, num_outputs, embedding, trajectory_length, key):
        assert embedding in ("number", "coordinate")
        if embedding == "coordinate":
            # TODO(synk): 'coordinate' embedding needs the external map.n_info lookup table.
            raise NotImplementedError("coordinate embedding not supported")
        self.embedding = embedding
        self.trajectory_length = trajectory_length
        self.embedding_size = OBS_FEATS + trajectory_length
        self.num_hiddens = num_hiddens
        self.num_outputs = num_outputs

        e, h, o, t = self.embedding_size, num_hiddens, num_outputs, trajectory_length
        k1, k2, k3, k4 = jax.random.split(key, 4)
        # PyTorch nn.Linear init: U(-1/sqrt(fan_in), 1/sqrt(fan_in)) (deterministic here).
        lim1 = 1.0 / jnp.sqrt(float(e))
        lim2 = 1.0 / jnp.sqrt(float(h))
        self.w1 = jax.random.uniform(k1, (e, h), jnp.float32, -lim1, lim1)
        self.b1 = jax.random.uniform(k2, (h,), jnp.float32, -lim1, lim1)
        self.w2 = jax.random.uniform(k3, (h, o), jnp.float32, -lim2, lim2)
        self.b2 = jax.random.uniform(k4, (o,), jnp.float32, -lim2, lim2)
        self.logZ = jnp.array([1.0], jnp.float32)

        # --- fold biases & pad once at construction time ----------------------
        h_pad = _round_up(h + 1, 128)   # reserve >=1 spare hidden column (b2 hook)
        o_pad = _round_up(o, 128)
        t_pad = _round_up(t + 1, 8)     # one-hot rows + the bias-input row
        bias_unit = h                   # index of the always-one hidden unit
        self._h_pad, self._o_pad, self._t_pad = h_pad, o_pad, t_pad

        # W1 rows for the 27 obs features (padded lanes); full-obs_dim versions
        # with zero rows for the unused feature columns are cached per obs_dim.
        self._w1_obs_pad = jnp.zeros((OBS_FEATS, h_pad), jnp.float32).at[:, :h].set(
            self.w1[:OBS_FEATS])
        self._w1a_cache = {}

        w1b = jnp.zeros((t_pad, h_pad), jnp.float32).at[:t, :h].set(self.w1[OBS_FEATS:])
        w1b = w1b.at[t, :h].set(self.b1)       # b1 via the always-one input column
        w1b = w1b.at[t, bias_unit].set(1.0)    # drives h[:, bias_unit] == 1.0
        w2p = jnp.zeros((h_pad, o_pad), jnp.float32).at[:h, :o].set(self.w2)
        w2p = w2p.at[bias_unit, :o].set(self.b2)   # b2 via the always-one hidden unit
        self._w1b = w1b
        self._w2p = w2p

    def _w1a_for(self, obs_dim):
        """W1 obs-rows padded to the full obs width (zero rows for cols >= 27)."""
        w1a = self._w1a_cache.get(obs_dim)
        if w1a is None:
            w1a = jnp.zeros((obs_dim, self._h_pad), jnp.float32)
            w1a = w1a.at[:OBS_FEATS, :].set(self._w1_obs_pad)
            self._w1a_cache[obs_dim] = w1a
        return w1a

    def forward_batch(self, obs_batch, step_counters, *, return_padded=False):
        """Batched forward: obs_batch (B, obs_dim>=27), step_counters (B,) ints.

        With return_padded=True the raw (B_pad, 128) kernel output is returned
        (valid data in [:B, :num_outputs]) so consumers can slice lazily and the
        padded array is never re-read by a separate slice op.
        """
        obs_batch = jnp.asarray(obs_batch)
        assert obs_batch.ndim == 2 and obs_batch.shape[1] >= OBS_FEATS, (
            f"obs must be (B, >= {OBS_FEATS}), got {obs_batch.shape}")
        b, obs_dim = obs_batch.shape
        tile_rows, _ = _choose_tiling(b)
        return _forward_batch_impl(
            obs_batch, jnp.asarray(step_counters),
            self._w1a_for(obs_dim), self._w1b, self._w2p,
            trajectory_length=self.trajectory_length,
            num_outputs=self.num_outputs,
            tile_rows=tile_rows,
            slice_output=not return_padded)

    def forward(self, obs, step_counter):
        """Module-equivalent forward: uses obs[0, :27] and a scalar step_counter."""
        probs = self.forward_batch(obs[0:1, :], jnp.asarray([step_counter]))
        return probs[0]


def _reference_forward_batch(model, obs_batch, step_counters):
    """Pure-JAX reference (eval-mode dropout) for correctness checking."""
    x_obs = jnp.asarray(obs_batch)[:, :OBS_FEATS].astype(jnp.float32)
    one_hot = jax.nn.one_hot(jnp.asarray(step_counters), model.trajectory_length,
                             dtype=jnp.float32)
    x = jnp.concatenate([x_obs, one_hot], axis=-1)
    h = jnp.dot(x, model.w1, precision=jax.lax.Precision.HIGHEST) + model.b1
    h = jnp.where(h > 0.0, h, 0.01 * h)
    y = jnp.dot(h, model.w2, precision=jax.lax.Precision.HIGHEST) + model.b2
    return jnp.maximum(y, 0.0)


if __name__ == "__main__":
    key = jax.random.PRNGKey(0)
    k_param, k_obs, k_steps, k_obs2, k_steps2 = jax.random.split(key, 5)

    num_hiddens = 32
    num_outputs = 8
    trajectory_length = 8          # embedding_size = 27 + 8 = 35
    obs_dim = 40                   # >= 27, as the module expects
    model = SamplerFCNFig8Pallas(
        num_hiddens=num_hiddens,
        num_outputs=num_outputs,
        embedding="number",
        trajectory_length=trajectory_length,
        key=k_param,
    )

    # --- small batch: 16 rows -> 2 parallel 8-row tiles ------------------------
    obs16 = jax.random.uniform(k_obs, (16, obs_dim), jnp.float32)
    steps16 = jax.random.randint(k_steps, (16,), 0, trajectory_length)
    got16 = jax.block_until_ready(model.forward_batch(obs16, steps16))
    ref16 = _reference_forward_batch(model, obs16, steps16)
    assert got16.shape == (16, num_outputs)
    assert jnp.allclose(got16, ref16, atol=1e-3, rtol=1e-3), (got16, ref16)

    # --- larger batch: 530 rows -> 2 parallel 272-row tiles (exercises padding) -
    obs530 = jax.random.uniform(k_obs2, (530, obs_dim), jnp.float32)
    steps530 = jax.random.randint(k_steps2, (530,), 0, trajectory_length)
    got530 = jax.block_until_ready(model.forward_batch(obs530, steps530))
    ref530 = _reference_forward_batch(model, obs530, steps530)
    assert got530.shape == (530, num_outputs)
    assert jnp.allclose(got530, ref530, atol=1e-3, rtol=1e-3), (got530, ref530)

    # --- padded-output path (lazy slice at the consumer) ------------------------
    got_pad = jax.block_until_ready(
        model.forward_batch(obs16, steps16, return_padded=True))
    assert got_pad.shape[1] == 128 and got_pad.shape[0] % 8 == 0
    assert jnp.allclose(got_pad[:16, :num_outputs], ref16, atol=1e-3, rtol=1e-3)

    # --- module-equivalent single-step path (obs[0], scalar step) ---------------
    obs = obs16[:2]                # batch=2 observation tensor; module uses row 0 only
    step_counter = 3
    probs = jax.block_until_ready(model.forward(obs, step_counter))
    ref = _reference_forward_batch(model, obs[0:1], jnp.asarray([step_counter]))[0]
    assert probs.shape == (num_outputs,)
    assert jnp.allclose(probs, ref, atol=1e-3, rtol=1e-3), (probs, ref)

    print("KERNEL_OK")
</pallas_src>

<mosaic_0001>
module attributes {stable_mosaic.version = 11 : i64} {
  func.func @_fused_sampler_kernel(%arg0: i32, %arg1: memref<8x40xf32, #tpu.memory_space<vmem>>, %arg2: memref<8x1xi32, #tpu.memory_space<vmem>>, %arg3: memref<40x128xf32, #tpu.memory_space<vmem>>, %arg4: memref<16x128xf32, #tpu.memory_space<vmem>>, %arg5: memref<128x128xf32, #tpu.memory_space<vmem>>, %arg6: memref<8x128xf32, #tpu.memory_space<vmem>>) attributes {dimension_semantics = [#tpu.dimension_semantics<parallel>], iteration_bounds = array<i64: 2>, scalar_prefetch = 0 : i64, scratch_operands = 0 : i64, tpu.core_type = #tpu.core_type<tc>, window_params = [{transform_indices = @transform_0, window_bounds = array<i64: 8, 40>}, {transform_indices = @transform_1, window_bounds = array<i64: 8, 1>}, {pipeline_mode = #tpu.pipeline_mode<synchronous>, transform_indices = @transform_2, window_bounds = array<i64: 40, 128>}, {pipeline_mode = #tpu.pipeline_mode<synchronous>, transform_indices = @transform_3, window_bounds = array<i64: 16, 128>}, {pipeline_mode = #tpu.pipeline_mode<synchronous>, transform_indices = @transform_4, window_bounds = array<i64: 128, 128>}, {transform_indices = @transform_5, window_bounds = array<i64: 8, 128>}]} {
    %0 = tpu.iota {dimensions = array<i32: 1>} : vector<8x16xi32>
    %c0 = arith.constant 0 : index
    %c0_0 = arith.constant 0 : index
    %1 = vector.load %arg2[%c0, %c0_0] : memref<8x1xi32, #tpu.memory_space<vmem>>, vector<8x1xi32>
    %2 = vector.broadcast %1 : vector<8x1xi32> to vector<8x16xi32>
    %3 = arith.cmpi eq, %0, %2 : vector<8x16xi32>
    %c8_i32 = arith.constant 8 : i32
    %4 = vector.broadcast %c8_i32 : i32 to vector<8x16xi32>
    %5 = arith.cmpi eq, %0, %4 : vector<8x16xi32>
    %6 = arith.ori %3, %5 : vector<8x16xi1>
    %7 = arith.extui %6 : vector<8x16xi1> to vector<8x16xi32>
    %8 = arith.sitofp %7 : vector<8x16xi32> to vector<8x16xf32>
    %c0_1 = arith.constant 0 : index
    %c0_2 = arith.constant 0 : index
    %9 = vector.load %arg1[%c0_1, %c0_2] : memref<8x40xf32, #tpu.memory_space<vmem>>, vector<8x40xf32>
    %c0_3 = arith.constant 0 : index
    %c0_4 = arith.constant 0 : index
    %10 = vector.load %arg3[%c0_3, %c0_4] : memref<40x128xf32, #tpu.memory_space<vmem>>, vector<40x128xf32>
    %cst = arith.constant dense<0.000000e+00> : vector<8x128xf32>
    %11 = tpu.matmul %9, %10, %cst {dimension_numbers = #tpu.dot_dimension_numbers<[1], [0], [0], [1], [0, 0, 1, 1], [], []>} : vector<8x40xf32>, vector<40x128xf32>, vector<8x128xf32> -> vector<8x128xf32>
    %c0_5 = arith.constant 0 : index
    %c0_6 = arith.constant 0 : index
    %12 = vector.load %arg4[%c0_5, %c0_6] : memref<16x128xf32, #tpu.memory_space<vmem>>, vector<16x128xf32>
    %cst_7 = arith.constant dense<0.000000e+00> : vector<8x128xf32>
    %13 = tpu.matmul %8, %12, %cst_7 {dimension_numbers = #tpu.dot_dimension_numbers<[1], [0], [0], [1], [0, 0, 1, 1], [], []>} : vector<8x16xf32>, vector<16x128xf32>, vector<8x128xf32> -> vector<8x128xf32>
    %14 = arith.addf %11, %13 : vector<8x128xf32>
    %cst_8 = arith.constant 0.000000e+00 : f32
    %15 = vector.broadcast %cst_8 : f32 to vector<8x128xf32>
    %16 = arith.cmpf ogt, %14, %15 : vector<8x128xf32>
    %cst_9 = arith.constant 0.00999999977 : f32
    %17 = vector.broadcast %cst_9 : f32 to vector<8x128xf32>
    %18 = arith.mulf %17, %14 : vector<8x128xf32>
    %19 = arith.select %16, %14, %18 : vector<8x128xi1>, vector<8x128xf32>
    %c0_10 = arith.constant 0 : index
    %c0_11 = arith.constant 0 : index
    %20 = vector.load %arg5[%c0_10, %c0_11] : memref<128x128xf32, #tpu.memory_space<vmem>>, vector<128x128xf32>
    %cst_12 = arith.constant dense<0.000000e+00> : vector<8x128xf32>
    %21 = tpu.matmul %19, %20, %cst_12 {dimension_numbers = #tpu.dot_dimension_numbers<[1], [0], [0], [1], [0, 0, 1, 1], [], []>} : vector<8x128xf32>, vector<128x128xf32>, vector<8x128xf32> -> vector<8x128xf32>
    %cst_13 = arith.constant 0.000000e+00 : f32
    %22 = vector.broadcast %cst_13 : f32 to vector<8x128xf32>
    %23 = arith.maximumf %21, %22 : vector<8x128xf32>
    %c0_14 = arith.constant 0 : index
    %c0_15 = arith.constant 0 : index
    %24 = vector.load %arg6[%c0_14, %c0_15] : memref<8x128xf32, #tpu.memory_space<vmem>>, vector<8x128xf32>
    tpu.vector_store %arg6[%c0_14, %c0_15], %23 {strides = array<i32>} : memref<8x128xf32, #tpu.memory_space<vmem>>, vector<8x128xf32>,
    return
  }
  func.func @transform_0(%arg0: i32) -> (i32, i32) {
    %c0_i32 = arith.constant 0 : i32
    %c0_i32_0 = arith.constant 0 : i32
    return %arg0, %c0_i32 : i32, i32
  }
  func.func @transform_1(%arg0: i32) -> (i32, i32) {
    %c0_i32 = arith.constant 0 : i32
    %c0_i32_0 = arith.constant 0 : i32
    return %arg0, %c0_i32 : i32, i32
  }
  func.func @transform_2(%arg0: i32) -> (i32, i32) {
    %c0_i32 = arith.constant 0 : i32
    %c0_i32_0 = arith.constant 0 : i32
    %c0_i32_1 = arith.constant 0 : i32
    return %c0_i32, %c0_i32_0 : i32, i32
  }
  func.func @transform_3(%arg0: i32) -> (i32, i32) {
    %c0_i32 = arith.constant 0 : i32
    %c0_i32_0 = arith.constant 0 : i32
    %c0_i32_1 = arith.constant 0 : i32
    return %c0_i32, %c0_i32_0 : i32, i32
  }
  func.func @transform_4(%arg0: i32) -> (i32, i32) {
    %c0_i32 = arith.constant 0 : i32
    %c0_i32_0 = arith.constant 0 : i32
    %c0_i32_1 = arith.constant 0 : i32
    return %c0_i32, %c0_i32_0 : i32, i32
  }
  func.func @transform_5(%arg0: i32) -> (i32, i32) {
    %c0_i32 = arith.constant 0 : i32
    %c0_i32_0 = arith.constant 0 : i32
    return %arg0, %c0_i32 : i32, i32
  }
}

</mosaic_0001>

<bundles_post_ra>
// kernel: _forward_batch_impl.1
= control target key start
LH: loop header
LB: loop body
LE: loop exit
PB: predicated region body
PF: predicated region fallthrough
CT: control target
= control target key end

     0   :  { %10 = vsyncpa [#allocation3], 0  ;;  %s1027_s0 = inlined_call_operand.vmem [shape: f32[16,40], index: 0, kind: input, shape index: {}]   ;;  %s1028_s1 = inlined_call_operand.vmem [shape: s32[16,1], index: 1, kind: input, shape index: {}]   ;;  %s1029_s2 = inlined_call_operand.hbm [shape: f32[40,128], index: 2, kind: input, shape index: {}]   ;;  %s1030_s3 = inlined_call_operand.hbm [shape: f32[16,128], index: 3, kind: input, shape index: {}]   ;;  %s1031_s4 = inlined_call_operand.hbm [shape: f32[128,128], index: 4, kind: input, shape index: {}]   ;;  %s1032_s5 = inlined_call_operand.vmem [shape: f32[16,128], index: 5, kind: output, shape index: {}]  }
   0x1   :  { %11 = vsyncpa [#allocation5], 0  ;;  %s912_s18 = smov 0  }
   0x2 LB: > { %s918_s19 = sadd.s32 4294967295, %s872_s18   ;;  %p637_p0 = scmp.ge.s32.totalorder %s872_s18, 1  ;;  %s872_s18 = sphi %s912_s18, %s17_s18  }
   0x3   : > { %p163_p1 = scmp.lt.s32.totalorder %s872_s18, 3  ;;  %p757_p2 = scmp.eq.s32.totalorder %s918_s19, 0 }
   0x4   : > { %s874_s21 = smov [#allocation4]   ;;  %s875_s23 = smov [#allocation2]  }
   0x5   : > { %p923_p3 = pnand %p637_p0, %p163_p1  ;;  %s188_s22 = sshll.u32 %s874_s21, 4  ;;  %s189_s22 = int_to_ptr.vmem [resolvable:$true] %s188_s22 }
   0x6   : > { %s175_s24 = sshll.u32 %s875_s23, 4  ;;  %s876_s26 = smov [#allocation6]   ;;  %s176_s24 = int_to_ptr.vmem [resolvable:$true] %s175_s24 }
   0x7   : > { %p747_p4 = pneg %p923_p3  ;;  %s201_s27 = sshll.u32 %s876_s26, 4  ;;  %s935_s27 = int_to_ptr.vmem [resolvable:$true] %s201_s27 }
   0x8   : > { %s791_s28 = scalar_lea.vmem %s189_s22, 256  ;;  %p799_p10 = scmp.lt.s32.totalorder %s189_s22, %s189_s22 }
   0x9   : > { %p931_p5 = pnand %p757_p2, %p747_p4  ;;  %p792_p7 = scmp.ne.s32.totalorder %s189_s22, %s791_s28 }
   0xa   : > { %p800_p11 = scmp.lt.s32.totalorder %s791_s28, %s791_s28 }
   0xb   : > { %p782_p6 = pneg %p931_p5 }
   0xc   : > { %p801_p12 = por %p800_p11, %p799_p10 }
   0xd   : > { %p794_p8 = pnand %p792_p7, %p782_p6 }
   0xf   : > { %p795_p9 = pneg %p794_p8 }
  0x11   : > { %p802_p13 = pnand %p801_p12, %p795_p9 }
  0x13   : > { %805 = shalt.err (!%p802_p13)
}
  0x14   : > { %s877_s29 = smov 128   ;;  %s878_s30 = smov 8  }
  0x15   : > { %753 = dma.hbm_to_vmem [thread:$0]  (!%p931_p5), %s1030_s3, 256, %s189_s22, [#allocation5], %s877_s29, %s877_s29, %s878_s30  }
  0x16   : > { %s817_s8 = scalar_lea.vmem %s176_s24, 640  ;;  %p825_p7 = scmp.lt.s32.totalorder %s176_s24, %s176_s24 }
  0x17   : > { %p818_p0 = scmp.ne.s32.totalorder %s176_s24, %s817_s8  ;;  %p826_p8 = scmp.lt.s32.totalorder %s817_s8, %s817_s8 }
  0x19   : > { %p820_p1 = pnand %p818_p0, %p782_p6  ;;  %p827_p10 = por %p826_p8, %p825_p7 }
  0x1b   : > { %p821_p4 = pneg %p820_p1 }
  0x1d   : > { %p828_p9 = pnand %p827_p10, %p821_p4 }
  0x1f   : > { %831 = shalt.err (!%p828_p9)
}
  0x20   : > { %750 = dma.hbm_to_vmem [thread:$0]  (!%p931_p5), %s1029_s2, 640, %s176_s24, [#allocation3], %s877_s29, %s877_s29, %s878_s30  }
  0x21   : > { %s843_s11 = scalar_lea.vmem %s935_s27, 2048  ;;  %p851_p0 = scmp.lt.s32.totalorder %s935_s27, %s935_s27 }
  0x22   : > { %p844_p11 = scmp.ne.s32.totalorder %s935_s27, %s843_s11  ;;  %p852_p1 = scmp.lt.s32.totalorder %s843_s11, %s843_s11 }
  0x24   : > { %p846_p12 = pnand %p844_p11, %p782_p6  ;;  %p853_p4 = por %p852_p1, %p851_p0 }
  0x26   : > { %p847_p13 = pneg %p846_p12 }
  0x28   : > { %p854_p7 = pnand %p853_p4, %p847_p13 }
  0x2a   : > { %857 = shalt.err (!%p854_p7)
}
  0x2b   : > { %756 = dma.hbm_to_vmem [thread:$0]  (!%p931_p5), %s1031_s4, 2048, %s935_s27, [#allocation5], %s877_s29, %s877_s29, %s878_s30  }
  0x2c   : > { %231 = sbr.rel (%p923_p3) target bundleno = 589 (0x24d), region = 40 }
  0x31   : > { %863 = dma.done.wait (%p757_p2), [#allocation3], 640  }
  0x32   : > { %865 = vsyncadd (%p757_p2), [#allocation3], 4294966656 }
  0x33   : > { %867 = dma.done.wait (%p757_p2), [#allocation5], 2304  }
  0x34   : > { %869 = vsyncadd (%p757_p2), [#allocation5], 4294964992  ;;  %p269_p6 = scmp.lt.s32.totalorder %s918_s19, 1  ;;  %v879_v0 = vmov 0   ;;  %v880_v1 = vmov 0.0   ;;  %vm881_vm0 = vmmov 0   ;;  %v281_v13 = vlaneseq }
  0x35   : > { %779 = vset.pattern.permute.xlu0 %v879_v0  ;;  %680 = vmatprep.subr.mxu1 %v880_v1  ;;  %v299_v3 = vld [vmem:[#allocation4 + $0x8] sm:$0xff]  ;;  %v298_v4 = vld [vmem:[#allocation4] sm:$0xff]  ;;  %v464_v7 = vld [vmem:[#allocation6 + $0x68] sm:$0xff]  ;;  %vm300_vm3 = vcmask 130048   ;;  %vm374_vm5 = vcmask 326656  }
  0x36   : > { %s1036_s19 = smov (!%p269_p6, %s918_s19), 1  ;;  %700 = vmatprep.subr.mxu0 %v880_v1  ;;  %684 = vmatprep.mubr.msk.f32.mxu1 %vm881_vm0, %v880_v1  ;;  %v466_v5 = vld [vmem:[#allocation6 + $0x78] sm:$0xff]  ;;  %v465_v6 = vld [vmem:[#allocation6 + $0x70] sm:$0xff]  ;;  %v463_v8 = vld [vmem:[#allocation6 + $0x60] sm:$0xff]  ;;  %v282_v14 = vand.u32 127, %v281_v13 }
  0x37   : > { %s982_s14 = sshll.u32 %s1036_s19, 3  ;;  %732 = vmatprep.mubr.msk.f32.mxu0 %vm881_vm0, %v880_v1  ;;  %681 = vmatpush3.msra.mxu1 %v299_v3  ;;  %v462_v9 = vld [vmem:[#allocation6 + $0x58] sm:$0xff]  ;;  %v461_v10 = vld [vmem:[#allocation6 + $0x50] sm:$0xff]  ;;  %v460_v11 = vld [vmem:[#allocation6 + $0x48] sm:$0xff] }
  0x38   : > { %s276_s17 = scalar_lea.vmem %s1028_s1, %s982_s14  ;;  %682 = vmatprep.subr.mxu1 %v880_v1  ;;  %701 = vmatpush3.msra.mxu0 %v466_v5  ;;  %v459_v12 = vld [vmem:[#allocation6 + $0x40] sm:$0xff]  ;;  %vm288_vm1 = vcmp.eq.s32.totalorder %v282_v14, 8  ;;  %v297_v16 = vld [vmem:[#allocation2 + $0x20] sm:$0xff]  ;;  %v295_v19 = vld [vmem:[#allocation2 + $0x10] sm:$0xff]  ;;  %s272_s21 = scalar_lea.vmem %s1027_s0, %s982_s14 }
  0x39   : > { %v283_v2 = vld [vmem:[%s276_s17] sm:$0xff]  ;;  %683 = vmatpush3.msra.mxu1 %v298_v4  ;;  %702 = vmatprep.subr.mxu0 %v880_v1  ;;  %v296_v18 = vld [vmem:[#allocation2 + $0x18] sm:$0xff]  ;;  %v294_v20 = vld [vmem:[#allocation2 + $0x8] sm:$0xff]  ;;  %s280_s24 = scalar_lea.vmem %s1032_s5, %s982_s14 }
  0x3a   : > { %285 = vperm.xlu0 %779, %v283_v2   ;;  %687 = vmatprep.subr.mxu1 %v880_v1  ;;  %v293_v21 = vld [vmem:[#allocation2] sm:$0xff]  ;;  %v458_v23 = vld [vmem:[#allocation6 + $0x38] sm:$0xff]  ;;  %v457_v24 = vld [vmem:[#allocation6 + $0x30] sm:$0xff] }
  0x3b   : > { %703 = vmatpush3.msra.mxu0 %v465_v6  ;;  %v292_v22 = vld [vmem:[%s272_s21] sm:$0xff]  ;;  %v455_v26 = vld [vmem:[#allocation6 + $0x20] sm:$0xff]  ;;  %v454_v27 = vld [vmem:[#allocation6 + $0x18] sm:$0xff] }
  0x3c   : > { %704 = vmatprep.subr.mxu0 %v880_v1  ;;  %v456_v25 = vld [vmem:[#allocation6 + $0x28] sm:$0xff]  ;;  %v453_v28 = vld [vmem:[#allocation6 + $0x10] sm:$0xff]  ;;  %v451_v30 = vld [vmem:[#allocation6] sm:$0xff] }
  0x3d   : > { %705 = vmatpush3.msra.mxu0 %v464_v7  ;;  %v452_v29 = vld [vmem:[#allocation6 + $0x8] sm:$0xff] }
  0x3e   : > { %706 = vmatprep.subr.mxu0 %v880_v1 }
  0x3f   : > { %707 = vmatpush3.msra.mxu0 %v463_v8 }
  0x40   : > { %708 = vmatprep.subr.mxu0 %v880_v1 }
  0x41   : > { %709 = vmatpush3.msra.mxu0 %v462_v9 }
  0x42   : > { %710 = vmatprep.subr.mxu0 %v880_v1 }
  0x43   : > { %711 = vmatpush3.msra.mxu0 %v461_v10 }
  0x44   : > { %712 = vmatprep.subr.mxu0 %v880_v1 }
  0x45   : > { %713 = vmatpush3.msra.mxu0 %v460_v11 }
  0x46   : > { %714 = vmatprep.subr.mxu0 %v880_v1 }
  0x47   : > { %715 = vmatpush3.msra.mxu0 %v459_v12 }
  0x48   : > { %716 = vmatprep.subr.mxu0 %v880_v1 }
  0x49   : > { %717 = vmatpush3.msra.mxu0 %v458_v23 }
  0x4a   : > { %718 = vmatprep.subr.mxu0 %v880_v1 }
  0x4b   : > { %719 = vmatpush3.msra.mxu0 %v457_v24 }
  0x4c   : > { %720 = vmatprep.subr.mxu0 %v880_v1 }
  0x4d   : > { %721 = vmatpush3.msra.mxu0 %v456_v25 }
  0x4e   : > { %722 = vmatprep.subr.mxu0 %v880_v1 }
  0x4f   : > { %723 = vmatpush3.msra.mxu0 %v455_v26 }
  0x50   : > { %724 = vmatprep.subr.mxu0 %v880_v1 }
  0x51   : > { %725 = vmatpush3.msra.mxu0 %v454_v27 }
  0x52   : > { %726 = vmatprep.subr.mxu0 %v880_v1 }
  0x53   : > { %727 = vmatpush3.msra.mxu0 %v453_v28 }
  0x54   : > { %728 = vmatprep.subr.mxu0 %v880_v1 }
  0x55   : > { %729 = vmatpush3.msra.mxu0 %v452_v29 }
  0x56   : > { %730 = vmatprep.subr.mxu0 %v880_v1 }
  0x57   : > { %731 = vmatpush3.msra.mxu0 %v451_v30 }
  0xb5   : > { %v286_v15 = vpop.permute.xlu0 %285 }
  0xb6   : > { %vm287_vm2 = vcmp.eq.s32.totalorder %v282_v14, %v286_v15 }
  0xb7   : > { %vm289_vm4 = vmor %vm287_vm2, %vm288_vm1 }
  0xb8   : > { %v649_v17 = vsel %vm289_vm4, 1.0, %v880_v1 }
  0xb9   : > { %685 = vmatmul.mubr.msk.f32.vlgmr.msra.gmra.mxu1 %vm300_vm3, %v649_v17 }
  0xba   : > { %688 = vmatpush3.msra.mxu1 %v297_v16  ;;  %697 = vmatprep.mubr.msk.f32.mxu1 %vm881_vm0, %v880_v1 }
  0xbb   : > { %689 = vmatprep.subr.mxu1 %v880_v1 }
  0xbc   : > { %690 = vmatpush3.msra.mxu1 %v296_v18 }
  0xbd   : > { %691 = vmatprep.subr.mxu1 %v880_v1 }
  0xbe   : > { %692 = vmatpush3.msra.mxu1 %v295_v19 }
  0xbf   : > { %693 = vmatprep.subr.mxu1 %v880_v1 }
  0xc0   : > { %694 = vmatpush3.msra.mxu1 %v294_v20 }
  0xc1   : > { %695 = vmatprep.subr.mxu1 %v880_v1 }
  0xc2   : > { %696 = vmatpush3.msra.mxu1 %v293_v21 }
  0xc3   : > { %698 = vmatmul.mubr.msk.f32.vlgmr.msra.gmra.mxu1 %vm374_vm5, %v292_v22 }
 0x179   : > { %v370_v31 = vpop.f32.mrf.mxu1 }
 0x17b   : > { %v686_v32 = vpop.f32.mrf.mxu1 }
 0x183   : > { %v444_v33 = vpop.f32.mrf.mxu1 }
 0x184   : > { %v445_v34 = vadd.f32 %v444_v33, %v370_v31 }
 0x185   : > { %v699_v35 = vpop.f32.mrf.mxu1 }
 0x186   : > { %v449_v36 = vmul.f32 0.01, %v445_v34  ;;  %vm448_vm6 = vcmp.gt.f32.partialorder %v445_v34, 0.0 }
 0x188   : > { %v450_v37 = vsel %vm448_vm6, %v445_v34, %v449_v36 }
 0x189   : > { %733 = vmatmul.mubr.f32.vlgmr.msra.gmra.mxu0 %v450_v37 }
 0x249   : > { %v533_v38 = vpop.f32.mrf.mxu0 }
 0x24a   : > { %v537_v39 = vmax.f32 %v533_v38, 0.0 }
 0x24b   : > { %v734_v40 = vpop.f32.mrf.mxu0 }
 0x24c   : > { %538 = vst [vmem:[%s280_s24] sm:$0xff] %v537_v39 }
 0x24d PF: > { %s17_s18 = sadd.s32 1, %s872_s18  }
 0x24e   : > { %p14_p2 = scmp.ge.s32.totalorder %s17_s18, 4  }
 0x250   :  { %16 = sbr.rel (!%p14_p2) target bundleno = 2 (0x2), region = 86 }
 0x255   :  { %558 = vsyncpa [#allocation3], 1 }
 0x256   :  { %560 = vsyncpa [#allocation3 + $0x1], 1 }
 0x257   :  { %561 = vsyncpa [#allocation5], 1 }

</bundles_post_ra>
